<compile_context>
chip_gen: v5e
topology: v5e:2x2
jax: 0.10.0
libtpu: 0.0.40
codegen_flags: <defaults>
</compile_context>

<pallas_src>
import math
import jax
import jax.numpy as jnp
from jax.experimental import pallas as pl
from jax.experimental.pallas import tpu as pltpu


def _lowrank_kernel(x_ref, w1t_ref, w2t_ref, b_ref, o_ref, h_ref):
    # x_ref:   (tm, in_features)
    # w1t_ref: (in_features, rank)   pre-transposed W1 -> canonical contraction
    # w2t_ref: (rank, tn)            pre-transposed W2 tile
    # b_ref:   (1, tn)
    # o_ref:   (tm, tn)
    # h_ref:   (tm, rank) f32 scratch; carries h across the j (out-tile) axis.
    @pl.when(pl.program_id(1) == 0)
    def _():
        h_ref[...] = jnp.dot(x_ref[...], w1t_ref[...],
                             preferred_element_type=jnp.float32)

    out = jnp.dot(h_ref[...].astype(w2t_ref.dtype), w2t_ref[...],
                  preferred_element_type=jnp.float32)
    o_ref[...] = (out + b_ref[...].astype(jnp.float32)).astype(o_ref.dtype)


def _round_up(n, m):
    return ((n + m - 1) // m) * m


def _vmem_capacity_bytes():
    # Per-TensorCore VMEM.  If the query fails (or reports something odd for a
    # multi-TC chip) we fall back to / clamp at conservative values; the
    # footprint-derived vmem_limit below further guards against overshoot.
    cap = 64 * 1024 * 1024  # conservative: v7x per-TC VMEM
    try:
        info = pltpu.get_tpu_info()
        cap = int(getattr(info, "vmem_capacity_bytes", cap))
    except Exception:
        pass
    return min(cap, 128 * 1024 * 1024)


def _tile_footprint_bytes(tm, tn, in_features, rank, x_bytes, w_bytes):
    """Approximate VMEM bytes resident for the chosen tiles."""
    return (in_features * rank * w_bytes        # W1^T, single-buffered (constant)
            + 2 * (rank * tn + tn) * w_bytes    # W2^T tile + bias, double-buffered
            + 2 * tm * in_features * x_bytes    # x tile, double-buffered
            + 2 * tm * tn * x_bytes             # out tile, double-buffered
            + tm * rank * 4                     # h scratch (f32)
            + tm * tn * 4)                      # f32 epilogue intermediate


def _choose_tiles(M, in_features, out_features, rank, x_bytes, w_bytes):
    vmem_cap = _vmem_capacity_bytes()
    budget = int(vmem_cap * 0.7)  # headroom for compiler scratch / metadata

    # Out-feature tile: on 64 MiB parts (v7x) keep the double-buffered output
    # slab small enough that a >=256-row x tile stays affordable; 128 MiB
    # parts (v5e/v6e) can afford a wider tile (less grid overhead).
    tn_cap = 2048 if vmem_cap <= (64 << 20) else 4096
    tn_candidates = [out_features] if out_features <= tn_cap else [tn_cap, 1024]

    # Row tile: HBM efficiency saturates ~512-1024 rows; larger tiles double
    # VMEM residency for ~1% and starve the pipeline of grid steps.
    tm_candidates = (1024, 512, 256, 128, 64, 32, 16, 8)

    tm, tn = 8, tn_candidates[-1]
    for tn_c in tn_candidates:
        found = None
        for tm_c in tm_candidates:
            if _tile_footprint_bytes(tm_c, tn_c, in_features, rank,
                                     x_bytes, w_bytes) <= budget:
                found = tm_c
                break
        if found is not None:
            tm, tn = found, tn_c
            if tm >= 256:        # good enough; narrower tn won't help further
                break

    # Don't tile past the actual number of rows.
    tm = min(tm, _round_up(M, 8))
    # Keep >= 2 row blocks so both TensorCores of a 2-TC chip get work ...
    if M > 8 and tm >= M:
        tm = _round_up(pl.cdiv(M, 2), 8)
    # ... and >= ~4 total grid steps so prefetch/compute overlap exists,
    # without dropping below the efficient-DMA regime (~256 rows).
    while tm > 256 and pl.cdiv(M, tm) * pl.cdiv(out_features, tn) < 4:
        tm = _round_up(max(tm // 2, 256), 8)
    return tm, tn, vmem_cap


def _build_lowrank_call(M, in_features, out_features, rank, tm, tn,
                        out_dtype, vmem_limit, cost, single_buffer_w1):
    grid = (pl.cdiv(M, tm), pl.cdiv(out_features, tn))
    w1_spec_kwargs = (
        dict(pipeline_mode=pl.Buffered(1)) if single_buffer_w1 else {})
    return pl.pallas_call(
        _lowrank_kernel,
        out_shape=jax.ShapeDtypeStruct((M, out_features), out_dtype),
        grid_spec=pltpu.PrefetchScalarGridSpec(
            num_scalar_prefetch=0,
            grid=grid,
            in_specs=[
                pl.BlockSpec((tm, in_features), lambda i, j: (i, 0)),
                pl.BlockSpec((in_features, rank), lambda i, j: (0, 0),
                             **w1_spec_kwargs),
                pl.BlockSpec((rank, tn), lambda i, j: (0, j)),
                pl.BlockSpec((1, tn), lambda i, j: (0, j)),
            ],
            out_specs=pl.BlockSpec((tm, tn), lambda i, j: (i, j)),
            scratch_shapes=[pltpu.VMEM((tm, rank), jnp.float32)],
        ),
        compiler_params=pltpu.CompilerParams(
            # i: independent row tiles -> megacore-shardable.
            # j: carries the h scratch across out-feature tiles -> arbitrary.
            dimension_semantics=("parallel", "arbitrary"),
            vmem_limit_bytes=vmem_limit,
        ),
        cost_estimate=cost,
    )


def lowrank_forward(x, lr_weight1, lr_weight2, bias=None, compute_dtype=None):
    """x: (..., in_features). Returns (..., out_features)."""
    rank, in_features = lr_weight1.shape
    out_features = lr_weight2.shape[0]
    assert x.shape[-1] == in_features
    assert lr_weight2.shape[1] == rank

    out_dtype = x.dtype
    if compute_dtype is not None:
        x = x.astype(compute_dtype)
        lr_weight1 = lr_weight1.astype(compute_dtype)
        lr_weight2 = lr_weight2.astype(compute_dtype)

    lead_shape = x.shape[:-1]
    M = int(math.prod(lead_shape)) if lead_shape else 1
    x2d = x.reshape(M, in_features)

    # One-time transposes (tiny: rank*(in+out) elements) so both in-kernel
    # matmuls contract on the major dim -- no per-step XLU transposes.
    w1t = jnp.transpose(lr_weight1)            # (in_features, rank)
    w2t = jnp.transpose(lr_weight2)            # (rank, out_features)

    if bias is None:
        bias = jnp.zeros((out_features,), lr_weight2.dtype)
    b2d = bias.reshape(1, out_features)

    x_bytes = jnp.dtype(x2d.dtype).itemsize
    w_bytes = jnp.dtype(w1t.dtype).itemsize
    tm, tn, vmem_cap = _choose_tiles(
        M, in_features, out_features, rank, x_bytes, w_bytes)

    # Footprint-derived VMEM limit (with margin), never below the platform
    # default 32 MiB and never above (the clamped) physical capacity.
    footprint = _tile_footprint_bytes(tm, tn, in_features, rank,
                                      x_bytes, w_bytes)
    vmem_limit = int(min(vmem_cap, max(1.5 * footprint + (2 << 20), 32 << 20)))

    # With h cached per row tile, each matmul executes exactly once per
    # element, so this estimate equals the executed work.
    cost = pl.CostEstimate(
        flops=2 * M * rank * (in_features + out_features),
        transcendentals=0,
        bytes_accessed=(M * in_features + M * out_features) * x_bytes
        + (rank * in_features + out_features * rank + out_features) * w_bytes,
    )

    args = (x2d, w1t, w2t, b2d)
    try:
        out2d = _build_lowrank_call(M, in_features, out_features, rank, tm, tn,
                                    out_dtype, vmem_limit, cost,
                                    single_buffer_w1=True)(*args)
    except Exception:
        # pl.Buffered(1) on the grid-invariant W1^T block is a pure VMEM
        # saving; fall back cleanly if this JAX build rejects single buffering.
        out2d = _build_lowrank_call(M, in_features, out_features, rank, tm, tn,
                                    out_dtype, vmem_limit, cost,
                                    single_buffer_w1=False)(*args)

    return out2d.reshape(*lead_shape, out_features)


def init_lowrank_params(key, in_features, out_features, rank, dtype=jnp.float32):
    """Deterministic init mirroring the module's reset_parameters (init='linear').

    kaiming_uniform_(w, a=sqrt(5)) -> U(-1/sqrt(fan_in), 1/sqrt(fan_in)).
    """
    k1, k2, k3 = jax.random.split(key, 3)
    bound1 = 1.0 / math.sqrt(in_features)   # fan_in of lr_weight1
    bound2 = 1.0 / math.sqrt(rank)          # fan_in of lr_weight2
    lr_weight1 = jax.random.uniform(
        k1, (rank, in_features), dtype, minval=-bound1, maxval=bound1)
    lr_weight2 = jax.random.uniform(
        k2, (out_features, rank), dtype, minval=-bound2, maxval=bound2)
    # bias bound uses fan_in of lr_weight1 (= in_features), as in the module.
    bias = jax.random.uniform(
        k3, (out_features,), dtype, minval=-bound1, maxval=bound1)
    return lr_weight1, lr_weight2, bias


if __name__ == "__main__":
    key = jax.random.PRNGKey(0)
    batch, seq = 2, 8
    in_features, out_features = 32, 32
    rank = 8   # rank = 0.25 * min(in, out)

    kp, kx = jax.random.split(key)
    lr_weight1, lr_weight2, bias = init_lowrank_params(
        kp, in_features, out_features, rank)
    x = jax.random.normal(kx, (batch, seq, in_features), jnp.float32)

    out = lowrank_forward(x, lr_weight1, lr_weight2, bias)
    jax.block_until_ready(out)

    # Reference check in plain JAX (same math as the F.linear chain).
    ref = (x @ lr_weight1.T) @ lr_weight2.T + bias
    assert out.shape == (batch, seq, out_features)
    assert jnp.allclose(out, ref, atol=1e-5, rtol=1e-5)

    # Exercise the reduced-precision path (halves HBM traffic; keeps v5e on
    # the fast MXU path).  bf16 operands, f32 accumulation -> loose tolerance.
    out_bf16 = lowrank_forward(x, lr_weight1, lr_weight2, bias,
                               compute_dtype=jnp.bfloat16)
    jax.block_until_ready(out_bf16)
    assert out_bf16.dtype == x.dtype
    assert jnp.allclose(out_bf16, ref, atol=5e-2, rtol=5e-2)

    print("KERNEL_OK")
</pallas_src>

<mosaic_0001>
module attributes {stable_mosaic.version = 11 : i64} {
  func.func @_lowrank_kernel(%arg0: i32, %arg1: i32, %arg2: memref<8x32xf32, #tpu.memory_space<vmem>>, %arg3: memref<32x8xf32, #tpu.memory_space<vmem>>, %arg4: memref<8x32xf32, #tpu.memory_space<vmem>>, %arg5: memref<1x32xf32, #tpu.memory_space<vmem>>, %arg6: memref<8x32xf32, #tpu.memory_space<vmem>>, %arg7: memref<8x8xf32, #tpu.memory_space<vmem>>) attributes {dimension_semantics = [#tpu.dimension_semantics<parallel>, #tpu.dimension_semantics<arbitrary>], iteration_bounds = array<i64: 2, 1>, scalar_prefetch = 0 : i64, scratch_operands = 1 : i64, tpu.core_type = #tpu.core_type<tc>, window_params = [{transform_indices = @transform_0, window_bounds = array<i64: 8, 32>}, {pipeline_mode = #tpu.pipeline_mode<synchronous>, transform_indices = @transform_1, window_bounds = array<i64: 32, 8>}, {transform_indices = @transform_2, window_bounds = array<i64: 8, 32>}, {transform_indices = @transform_3, window_bounds = array<i64: 1, 32>}, {transform_indices = @transform_4, window_bounds = array<i64: 8, 32>}]} {
    %c0_i32 = arith.constant 0 : i32
    %0 = arith.cmpi eq, %arg1, %c0_i32 : i32
    %1 = arith.extui %0 : i1 to i32
    %c0_i32_0 = arith.constant 0 : i32
    %2 = arith.cmpi ne, %1, %c0_i32_0 : i32
    scf.if %2 {
      %c0_8 = arith.constant 0 : index
      %c0_9 = arith.constant 0 : index
      %10 = vector.load %arg2[%c0_8, %c0_9] : memref<8x32xf32, #tpu.memory_space<vmem>>, vector<8x32xf32>
      %c0_10 = arith.constant 0 : index
      %c0_11 = arith.constant 0 : index
      %11 = vector.load %arg3[%c0_10, %c0_11] : memref<32x8xf32, #tpu.memory_space<vmem>>, vector<32x8xf32>
      %cst_12 = arith.constant dense<0.000000e+00> : vector<8x8xf32>
      %12 = tpu.matmul %10, %11, %cst_12 {dimension_numbers = #tpu.dot_dimension_numbers<[1], [0], [0], [1], [0, 0, 1, 1], [], []>} : vector<8x32xf32>, vector<32x8xf32>, vector<8x8xf32> -> vector<8x8xf32>
      %c0_13 = arith.constant 0 : index
      %c0_14 = arith.constant 0 : index
      %13 = vector.load %arg7[%c0_13, %c0_14] : memref<8x8xf32, #tpu.memory_space<vmem>>, vector<8x8xf32>
      tpu.vector_store %arg7[%c0_13, %c0_14], %12 {strides = array<i32>} : memref<8x8xf32, #tpu.memory_space<vmem>>, vector<8x8xf32>,
    } else {
    }
    %c0 = arith.constant 0 : index
    %c0_1 = arith.constant 0 : index
    %3 = vector.load %arg7[%c0, %c0_1] : memref<8x8xf32, #tpu.memory_space<vmem>>, vector<8x8xf32>
    %c0_2 = arith.constant 0 : index
    %c0_3 = arith.constant 0 : index
    %4 = vector.load %arg4[%c0_2, %c0_3] : memref<8x32xf32, #tpu.memory_space<vmem>>, vector<8x32xf32>
    %cst = arith.constant dense<0.000000e+00> : vector<8x32xf32>
    %5 = tpu.matmul %3, %4, %cst {dimension_numbers = #tpu.dot_dimension_numbers<[1], [0], [0], [1], [0, 0, 1, 1], [], []>} : vector<8x8xf32>, vector<8x32xf32>, vector<8x32xf32> -> vector<8x32xf32>
    %c0_4 = arith.constant 0 : index
    %c0_5 = arith.constant 0 : index
    %6 = vector.load %arg5[%c0_4, %c0_5] : memref<1x32xf32, #tpu.memory_space<vmem>>, vector<1x32xf32>
    %7 = vector.broadcast %6 : vector<1x32xf32> to vector<8x32xf32>
    %8 = arith.addf %5, %7 : vector<8x32xf32>
    %c0_6 = arith.constant 0 : index
    %c0_7 = arith.constant 0 : index
    %9 = vector.load %arg6[%c0_6, %c0_7] : memref<8x32xf32, #tpu.memory_space<vmem>>, vector<8x32xf32>
    tpu.vector_store %arg6[%c0_6, %c0_7], %8 {strides = array<i32>} : memref<8x32xf32, #tpu.memory_space<vmem>>, vector<8x32xf32>,
    return
  }
  func.func @transform_0(%arg0: i32, %arg1: i32) -> (i32, i32) {
    %c0_i32 = arith.constant 0 : i32
    %c0_i32_0 = arith.constant 0 : i32
    return %arg0, %c0_i32 : i32, i32
  }
  func.func @transform_1(%arg0: i32, %arg1: i32) -> (i32, i32) {
    %c0_i32 = arith.constant 0 : i32
    %c0_i32_0 = arith.constant 0 : i32
    %c0_i32_1 = arith.constant 0 : i32
    return %c0_i32, %c0_i32_0 : i32, i32
  }
  func.func @transform_2(%arg0: i32, %arg1: i32) -> (i32, i32) {
    %c0_i32 = arith.constant 0 : i32
    %c0_i32_0 = arith.constant 0 : i32
    return %c0_i32, %arg1 : i32, i32
  }
  func.func @transform_3(%arg0: i32, %arg1: i32) -> (i32, i32) {
    %c0_i32 = arith.constant 0 : i32
    %c0_i32_0 = arith.constant 0 : i32
    return %c0_i32, %arg1 : i32, i32
  }
  func.func @transform_4(%arg0: i32, %arg1: i32) -> (i32, i32) {
    %c0_i32 = arith.constant 0 : i32
    return %arg0, %arg1 : i32, i32
  }
}

module attributes {stable_mosaic.version = 11 : i64} {
  func.func @_lowrank_kernel(%arg0: i32, %arg1: i32, %arg2: memref<8x32xf32, #tpu.memory_space<vmem>>, %arg3: memref<32x8xf32, #tpu.memory_space<vmem>>, %arg4: memref<8x32xf32, #tpu.memory_space<vmem>>, %arg5: memref<1x32xf32, #tpu.memory_space<vmem>>, %arg6: memref<8x32xf32, #tpu.memory_space<vmem>>, %arg7: memref<8x8xf32, #tpu.memory_space<vmem>>) attributes {dimension_semantics = [#tpu.dimension_semantics<parallel>, #tpu.dimension_semantics<arbitrary>], iteration_bounds = array<i64: 2, 1>, scalar_prefetch = 0 : i64, scratch_operands = 1 : i64, tpu.core_type = #tpu.core_type<tc>, window_params = [{transform_indices = @transform_0, window_bounds = array<i64: 8, 32>}, {pipeline_mode = #tpu.pipeline_mode<synchronous>, transform_indices = @transform_1, window_bounds = array<i64: 32, 8>}, {transform_indices = @transform_2, window_bounds = array<i64: 8, 32>}, {transform_indices = @transform_3, window_bounds = array<i64: 1, 32>}, {transform_indices = @transform_4, window_bounds = array<i64: 8, 32>}]} {
    %c0_i32 = arith.constant 0 : i32
    %0 = arith.cmpi eq, %arg1, %c0_i32 : i32
    %1 = arith.extui %0 : i1 to i32
    %c0_i32_0 = arith.constant 0 : i32
    %2 = arith.cmpi ne, %1, %c0_i32_0 : i32
    scf.if %2 {
      %c0_8 = arith.constant 0 : index
      %c0_9 = arith.constant 0 : index
      %10 = vector.load %arg2[%c0_8, %c0_9] : memref<8x32xf32, #tpu.memory_space<vmem>>, vector<8x32xf32>
      %c0_10 = arith.constant 0 : index
      %c0_11 = arith.constant 0 : index
      %11 = vector.load %arg3[%c0_10, %c0_11] : memref<32x8xf32, #tpu.memory_space<vmem>>, vector<32x8xf32>
      %cst_12 = arith.constant dense<0.000000e+00> : vector<8x8xf32>
      %12 = tpu.matmul %10, %11, %cst_12 {dimension_numbers = #tpu.dot_dimension_numbers<[1], [0], [0], [1], [0, 0, 1, 1], [], []>} : vector<8x32xf32>, vector<32x8xf32>, vector<8x8xf32> -> vector<8x8xf32>
      %c0_13 = arith.constant 0 : index
      %c0_14 = arith.constant 0 : index
      %13 = vector.load %arg7[%c0_13, %c0_14] : memref<8x8xf32, #tpu.memory_space<vmem>>, vector<8x8xf32>
      tpu.vector_store %arg7[%c0_13, %c0_14], %12 {strides = array<i32>} : memref<8x8xf32, #tpu.memory_space<vmem>>, vector<8x8xf32>,
    } else {
    }
    %c0 = arith.constant 0 : index
    %c0_1 = arith.constant 0 : index
    %3 = vector.load %arg7[%c0, %c0_1] : memref<8x8xf32, #tpu.memory_space<vmem>>, vector<8x8xf32>
    %c0_2 = arith.constant 0 : index
    %c0_3 = arith.constant 0 : index
    %4 = vector.load %arg4[%c0_2, %c0_3] : memref<8x32xf32, #tpu.memory_space<vmem>>, vector<8x32xf32>
    %cst = arith.constant dense<0.000000e+00> : vector<8x32xf32>
    %5 = tpu.matmul %3, %4, %cst {dimension_numbers = #tpu.dot_dimension_numbers<[1], [0], [0], [1], [0, 0, 1, 1], [], []>} : vector<8x8xf32>, vector<8x32xf32>, vector<8x32xf32> -> vector<8x32xf32>
    %c0_4 = arith.constant 0 : index
    %c0_5 = arith.constant 0 : index
    %6 = vector.load %arg5[%c0_4, %c0_5] : memref<1x32xf32, #tpu.memory_space<vmem>>, vector<1x32xf32>
    %7 = vector.broadcast %6 : vector<1x32xf32> to vector<8x32xf32>
    %8 = arith.addf %5, %7 : vector<8x32xf32>
    %c0_6 = arith.constant 0 : index
    %c0_7 = arith.constant 0 : index
    %9 = vector.load %arg6[%c0_6, %c0_7] : memref<8x32xf32, #tpu.memory_space<vmem>>, vector<8x32xf32>
    tpu.vector_store %arg6[%c0_6, %c0_7], %8 {strides = array<i32>} : memref<8x32xf32, #tpu.memory_space<vmem>>, vector<8x32xf32>,
    return
  }
  func.func @transform_0(%arg0: i32, %arg1: i32) -> (i32, i32) {
    %c0_i32 = arith.constant 0 : i32
    %c0_i32_0 = arith.constant 0 : i32
    return %arg0, %c0_i32 : i32, i32
  }
  func.func @transform_1(%arg0: i32, %arg1: i32) -> (i32, i32) {
    %c0_i32 = arith.constant 0 : i32
    %c0_i32_0 = arith.constant 0 : i32
    %c0_i32_1 = arith.constant 0 : i32
    return %c0_i32, %c0_i32_0 : i32, i32
  }
  func.func @transform_2(%arg0: i32, %arg1: i32) -> (i32, i32) {
    %c0_i32 = arith.constant 0 : i32
    %c0_i32_0 = arith.constant 0 : i32
    return %c0_i32, %arg1 : i32, i32
  }
  func.func @transform_3(%arg0: i32, %arg1: i32) -> (i32, i32) {
    %c0_i32 = arith.constant 0 : i32
    %c0_i32_0 = arith.constant 0 : i32
    return %c0_i32, %arg1 : i32, i32
  }
  func.func @transform_4(%arg0: i32, %arg1: i32) -> (i32, i32) {
    %c0_i32 = arith.constant 0 : i32
    return %arg0, %arg1 : i32, i32
  }
}

</mosaic_0001>

<bundles_post_ra>
// kernel: tpu_custom_call.1
= control target key start
LH: loop header
LB: loop body
LE: loop exit
PB: predicated region body
PF: predicated region fallthrough
CT: control target
= control target key end

     0   :  { %9 = vsyncpa [#allocation4], 0  ;;  %s710_s0 = inlined_call_operand.vmem [shape: f32[16,32], index: 0, kind: input, shape index: {}]   ;;  %s711_s1 = inlined_call_operand.vmem [shape: f32[32,8], index: 1, kind: input, shape index: {}]   ;;  %s712_s2 = inlined_call_operand.vmem [shape: f32[8,32], index: 2, kind: input, shape index: {}]   ;;  %s713_s3 = inlined_call_operand.vmem [shape: f32[1,32], index: 3, kind: input, shape index: {}]   ;;  %s714_s4 = inlined_call_operand.hbm [shape: f32[16,32], index: 4, kind: output, shape index: {}]  }
   0x1   :  { %11 = vsyncpa [#allocation4 + $0x1], 0  ;;  %s593_s15 = smov 0   ;;  %s595_s16 = smov 0  }
   0x2   :  { %s597_s17 = smov 0   ;;  %s599_s18 = smov 0  }
   0x3   :  { %s601_s19 = smov 0   ;;  %s603_s20 = smov 0  }
   0x4 LB: > { %s417_s21 = sadd.s32 4294967295, %s566_s20   ;;  %s418_s22 = sadd.s32 4294967294, %s566_s20   ;;  %s566_s20 = sphi %s603_s20, %s17_s20   ;;  %s562_s19 = sphi %s601_s19, %s721_s19   ;;  %s558_s18 = sphi %s599_s18, %s720_s18   ;;  %s554_s17 = sphi %s597_s17, %s719_s17   ;;  %s550_s16 = sphi %s595_s16, %s718_s16   ;;  %s546_s15 = sphi %s593_s15, %s717_s15  }
   0x5   : > { %s29_s23 = sadd.s32 1, %s562_s19  ;;  %s137_s24 = sadd.s32 1, %s554_s17 }
   0x6   : > { %p31_p0 = scmp.ge.s32.totalorder %s29_s23, 2  ;;  %p147_p1 = scmp.ne.s32.totalorder %s554_s17, %s550_s16 }
   0x7   : > { %p148_p2 = scmp.eq.s32.totalorder %s417_s21, 1  ;;  %p153_p3 = scmp.ne.s32.totalorder %s550_s16, %s546_s15 }
   0x8   : > { %s723_s23 = smov (%p31_p0, %s29_s23), 0  ;;  %p154_p5 = scmp.eq.s32.totalorder %s418_s22, 1 }
   0x9   : > { %p633_p4 = por %p148_p2, %p147_p1  ;;  %s132_s26 = ssub.s32 %s562_s19, %s723_s23 }
   0xa   : > { %p423_p6 = scmp.ge.s32.totalorder %s566_s20, 1  ;;  %p135_p7 = scmp.eq.s32.totalorder %s132_s26, 0 }
   0xb   : > { %p640_p8 = por %p154_p5, %p153_p3  ;;  %p195_p9 = scmp.lt.s32.totalorder %s566_s20, 3 }
   0xc   : > { %s646_s28 = scalar_select %p135_p7, %s554_s17, %s137_s24  }
   0xd   : > { %p196_p10 = pnand %p423_p6, %p195_p9 }
   0xe   : > { %p227_p11 = scmp.lt.s32.totalorder (!%p196_p10), %s558_s18, 1  ;;  %s224_s26 = sand.u32 (!%p196_p10), 1, %s550_s16  }
   0xf   : > { %199 = sbr.rel (%p196_p10) target bundleno = 293 (0x125), region = 36  ;;  %s424_s29 = sshll.u32 (!%p196_p10), %s224_s26, 3 }
  0x10   : > { %s429_s30 = sshll.u32 (!%p196_p10), %s558_s18, 3  ;;  %s226_s10 = scalar_lea.vmem (!%p196_p10), [#allocation3], %s424_s29 }
  0x11   : > { %s317_s7 = scalar_lea.hbm (!%p196_p10), %s714_s4, %s429_s30  ;;  %s319_s11 = sshll.u32 (!%p196_p10), %s226_s10, 4  ;;  %s320_s11 = int_to_ptr.vmem [resolvable:$true] %s319_s11 }
  0x12   : > { %s306_s13 = scalar_lea.sflag (!%p196_p10), [#allocation4], %s224_s26  ;;  %s508_s24 = scalar_lea.hbm (!%p196_p10), %s714_s4, 16 }
  0x14   : > { %v246_v0 = vld [vmem:[%s711_s1 + $0x18] sm:$0xff]  ;;  %v245_v1 = vld [vmem:[%s711_s1 + $0x10] sm:$0xff]  ;;  %v244_v2 = vld [vmem:[%s711_s1 + $0x8] sm:$0xff]  ;;  %s228_s9 = scalar_select %p227_p11, %s558_s18, 1  ;;  %vm247_vm0 = vcmask 261120   ;;  %vm271_vm1 = vcmask 64512  }
  0x15   : > { %263 = vmatpush.msra.mxu0 %v246_v0  ;;  %v243_v3 = vld [vmem:[%s711_s1] sm:$0xff] }
  0x16   : > { %s425_s12 = sshll.u32 %s228_s9, 3  ;;  %v274_v5 = vld [vmem:[%s712_s2] sm:$0xff] }
  0x17   : > { %264 = vmatpush.msra.mxu0 %v245_v1  ;;  %s230_s21 = scalar_lea.vmem %s710_s0, %s425_s12  ;;  %298 = vmatpush.msra.mxu1 %v274_v5  ;;  %v487_v8 = vld [vmem:[%s713_s3] ss:$0 sm:$0xff]  ;;  %s321_s12 = sshll.u32 %s317_s7, 4  ;;  %s322_s12 = int_to_ptr.hbm [resolvable:$true] %s321_s12 }
  0x18   : > { %v242_v4 = vld [vmem:[%s230_s21] sm:$0xff]  ;;  %s502_s18 = sshra.s32 %s322_s12, 4  ;;  %s503_s18 = int_to_ptr.hbm [resolvable:$true] %s502_s18 }
  0x19   : > { %265 = vmatpush.msra.mxu0 %v244_v2  ;;  %s504_s14 = scalar_lea.hbm %s503_s18, 8  ;;  %p509_p1 = scmp.lt.s32.totalorder %s503_s18, %s714_s4 }
  0x1a   : > { %p505_p12 = scmp.ne.s32.totalorder %s503_s18, %s504_s14  ;;  %p510_p2 = scmp.lt.s32.totalorder %s508_s24, %s504_s14 }
  0x1b   : > { %266 = vmatpush.msra.mxu0 %v243_v3 }
  0x1c   : > { %426 = vmatmul.msk.f32.vlgmr.msra.gmra.mxu0 %vm247_vm0, %v242_v4  ;;  %p506_p13 = pnand %p505_p12, %p633_p4  ;;  %p511_p3 = por %p510_p2, %p509_p1 }
  0x1e   : > { %p507_p0 = pneg %p506_p13 }
  0x20   : > { %p512_p5 = pnand %p511_p3, %p507_p0 }
  0x99   : > { %v268_v6 = vpop.f32.mrf.mxu0 }
  0x9a   : > { %272 = vst.msk [vmem:[#allocation2] sm:$0xff] %vm271_vm1, %v268_v6 }
  0xa1   : > { %v273_v7 = vld [vmem:[#allocation2] sm:$0xff] }
  0xa2   : > { %427 = vmatmul.msk.f32.vlgmr.msra.gmra.mxu1 %vm271_vm1, %v273_v7 }
 0x11f   : > { %v300_v9 = vpop.f32.mrf.mxu1 }
 0x120   : > { %v301_v10 = vadd.f32 %v487_v8, %v300_v9 }
 0x122   : > { %304 = vst.msk [vmem:[%s226_s10] sm:$0xff] %vm247_vm0, %v301_v10 }
 0x123   : > { %515 = shalt.err (!%p512_p5)
}
 0x124   : > { %432 = dma.vmem_to_hbm [thread:$0]  (%p633_p4), %s320_s11, 128, %s322_s12, %s306_s13  }
 0x125 PF: > { %p438_p6 = scmp.ge.s32.totalorder %s566_s20, 2  ;;  %s333_s26 = sand.u32 1, %s546_s15  }
 0x126   : > { %s334_s5 = scalar_lea.sflag [#allocation4], %s333_s26 }
 0x127   : > { %p435_p7 = pnand %p438_p6, %p640_p8 }
 0x129   : > { %p436_p9 = pneg %p435_p7 }
 0x12b   : > { %541 = dma.done.wait (%p436_p9), %s334_s5, 128  }
 0x12c   : > { %543 = vsyncadd (%p436_p9), %s334_s5, 4294967168  ;;  %s17_s20 = sadd.s32 1, %s566_s20   ;;  %s717_s15 = smov %s550_s16 }
 0x12d   : > { %p14_p10 = scmp.ge.s32.totalorder %s17_s20, 4   ;;  %s718_s16 = smov %s554_s17 }
 0x12e   : > { %s719_s17 = smov %s646_s28  ;;  %s720_s18 = smov %s562_s19 }
 0x12f   : > { %s721_s19 = smov %s723_s23  ;;  %16 = sbr.rel (!%p14_p10) target bundleno = 4 (0x4), region = 81 }
 0x134   :  { %340 = vsyncpa [#allocation4], 1 }
 0x135   :  { %342 = vsyncpa [#allocation4 + $0x1], 1 }

// kernel: tpu_custom_call.1
= control target key start
LH: loop header
LB: loop body
LE: loop exit
PB: predicated region body
PF: predicated region fallthrough
CT: control target
= control target key end

     0   :  { %9 = vsyncpa [#allocation4], 0  ;;  %s710_s0 = inlined_call_operand.vmem [shape: f32[16,32], index: 0, kind: input, shape index: {}]   ;;  %s711_s1 = inlined_call_operand.vmem [shape: f32[32,8], index: 1, kind: input, shape index: {}]   ;;  %s712_s2 = inlined_call_operand.vmem [shape: f32[8,32], index: 2, kind: input, shape index: {}]   ;;  %s713_s3 = inlined_call_operand.vmem [shape: f32[1,32], index: 3, kind: input, shape index: {}]   ;;  %s714_s4 = inlined_call_operand.hbm [shape: f32[16,32], index: 4, kind: output, shape index: {}]  }
   0x1   :  { %11 = vsyncpa [#allocation4 + $0x1], 0  ;;  %s593_s15 = smov 0   ;;  %s595_s16 = smov 0  }
   0x2   :  { %s597_s17 = smov 0   ;;  %s599_s18 = smov 0  }
   0x3   :  { %s601_s19 = smov 0   ;;  %s603_s20 = smov 0  }
   0x4 LB: > { %s417_s21 = sadd.s32 4294967295, %s566_s20   ;;  %s418_s22 = sadd.s32 4294967294, %s566_s20   ;;  %s566_s20 = sphi %s603_s20, %s17_s20   ;;  %s562_s19 = sphi %s601_s19, %s721_s19   ;;  %s558_s18 = sphi %s599_s18, %s720_s18   ;;  %s554_s17 = sphi %s597_s17, %s719_s17   ;;  %s550_s16 = sphi %s595_s16, %s718_s16   ;;  %s546_s15 = sphi %s593_s15, %s717_s15  }
   0x5   : > { %s29_s23 = sadd.s32 1, %s562_s19  ;;  %s137_s24 = sadd.s32 1, %s554_s17 }
   0x6   : > { %p31_p0 = scmp.ge.s32.totalorder %s29_s23, 2  ;;  %p147_p1 = scmp.ne.s32.totalorder %s554_s17, %s550_s16 }
   0x7   : > { %p148_p2 = scmp.eq.s32.totalorder %s417_s21, 1  ;;  %p153_p3 = scmp.ne.s32.totalorder %s550_s16, %s546_s15 }
   0x8   : > { %s723_s23 = smov (%p31_p0, %s29_s23), 0  ;;  %p154_p5 = scmp.eq.s32.totalorder %s418_s22, 1 }
   0x9   : > { %p633_p4 = por %p148_p2, %p147_p1  ;;  %s132_s26 = ssub.s32 %s562_s19, %s723_s23 }
   0xa   : > { %p423_p6 = scmp.ge.s32.totalorder %s566_s20, 1  ;;  %p135_p7 = scmp.eq.s32.totalorder %s132_s26, 0 }
   0xb   : > { %p640_p8 = por %p154_p5, %p153_p3  ;;  %p195_p9 = scmp.lt.s32.totalorder %s566_s20, 3 }
   0xc   : > { %s646_s28 = scalar_select %p135_p7, %s554_s17, %s137_s24  }
   0xd   : > { %p196_p10 = pnand %p423_p6, %p195_p9 }
   0xe   : > { %p227_p11 = scmp.lt.s32.totalorder (!%p196_p10), %s558_s18, 1  ;;  %s224_s26 = sand.u32 (!%p196_p10), 1, %s550_s16  }
   0xf   : > { %199 = sbr.rel (%p196_p10) target bundleno = 293 (0x125), region = 36  ;;  %s424_s29 = sshll.u32 (!%p196_p10), %s224_s26, 3 }
  0x10   : > { %s429_s30 = sshll.u32 (!%p196_p10), %s558_s18, 3  ;;  %s226_s10 = scalar_lea.vmem (!%p196_p10), [#allocation3], %s424_s29 }
  0x11   : > { %s317_s7 = scalar_lea.hbm (!%p196_p10), %s714_s4, %s429_s30  ;;  %s319_s11 = sshll.u32 (!%p196_p10), %s226_s10, 4  ;;  %s320_s11 = int_to_ptr.vmem [resolvable:$true] %s319_s11 }
  0x12   : > { %s306_s13 = scalar_lea.sflag (!%p196_p10), [#allocation4], %s224_s26  ;;  %s508_s24 = scalar_lea.hbm (!%p196_p10), %s714_s4, 16 }
  0x14   : > { %v246_v0 = vld [vmem:[%s711_s1 + $0x18] sm:$0xff]  ;;  %v245_v1 = vld [vmem:[%s711_s1 + $0x10] sm:$0xff]  ;;  %v244_v2 = vld [vmem:[%s711_s1 + $0x8] sm:$0xff]  ;;  %s228_s9 = scalar_select %p227_p11, %s558_s18, 1  ;;  %vm247_vm0 = vcmask 261120   ;;  %vm271_vm1 = vcmask 64512  }
  0x15   : > { %263 = vmatpush.msra.mxu0 %v246_v0  ;;  %v243_v3 = vld [vmem:[%s711_s1] sm:$0xff] }
  0x16   : > { %s425_s12 = sshll.u32 %s228_s9, 3  ;;  %v274_v5 = vld [vmem:[%s712_s2] sm:$0xff] }
  0x17   : > { %264 = vmatpush.msra.mxu0 %v245_v1  ;;  %s230_s21 = scalar_lea.vmem %s710_s0, %s425_s12  ;;  %298 = vmatpush.msra.mxu1 %v274_v5  ;;  %v487_v8 = vld [vmem:[%s713_s3] ss:$0 sm:$0xff]  ;;  %s321_s12 = sshll.u32 %s317_s7, 4  ;;  %s322_s12 = int_to_ptr.hbm [resolvable:$true] %s321_s12 }
  0x18   : > { %v242_v4 = vld [vmem:[%s230_s21] sm:$0xff]  ;;  %s502_s18 = sshra.s32 %s322_s12, 4  ;;  %s503_s18 = int_to_ptr.hbm [resolvable:$true] %s502_s18 }
  0x19   : > { %265 = vmatpush.msra.mxu0 %v244_v2  ;;  %s504_s14 = scalar_lea.hbm %s503_s18, 8  ;;  %p509_p1 = scmp.lt.s32.totalorder %s503_s18, %s714_s4 }
  0x1a   : > { %p505_p12 = scmp.ne.s32.totalorder %s503_s18, %s504_s14  ;;  %p510_p2 = scmp.lt.s32.totalorder %s508_s24, %s504_s14 }
  0x1b   : > { %266 = vmatpush.msra.mxu0 %v243_v3 }
  0x1c   : > { %426 = vmatmul.msk.f32.vlgmr.msra.gmra.mxu0 %vm247_vm0, %v242_v4  ;;  %p506_p13 = pnand %p505_p12, %p633_p4  ;;  %p511_p3 = por %p510_p2, %p509_p1 }
  0x1e   : > { %p507_p0 = pneg %p506_p13 }
  0x20   : > { %p512_p5 = pnand %p511_p3, %p507_p0 }
  0x99   : > { %v268_v6 = vpop.f32.mrf.mxu0 }
  0x9a   : > { %272 = vst.msk [vmem:[#allocation2] sm:$0xff] %vm271_vm1, %v268_v6 }
  0xa1   : > { %v273_v7 = vld [vmem:[#allocation2] sm:$0xff] }
  0xa2   : > { %427 = vmatmul.msk.f32.vlgmr.msra.gmra.mxu1 %vm271_vm1, %v273_v7 }
 0x11f   : > { %v300_v9 = vpop.f32.mrf.mxu1 }
 0x120   : > { %v301_v10 = vadd.f32 %v487_v8, %v300_v9 }
 0x122   : > { %304 = vst.msk [vmem:[%s226_s10] sm:$0xff] %vm247_vm0, %v301_v10 }
 0x123   : > { %515 = shalt.err (!%p512_p5)
}
 0x124   : > { %432 = dma.vmem_to_hbm [thread:$0]  (%p633_p4), %s320_s11, 128, %s322_s12, %s306_s13  }
 0x125 PF: > { %p438_p6 = scmp.ge.s32.totalorder %s566_s20, 2  ;;  %s333_s26 = sand.u32 1, %s546_s15  }
 0x126   : > { %s334_s5 = scalar_lea.sflag [#allocation4], %s333_s26 }
 0x127   : > { %p435_p7 = pnand %p438_p6, %p640_p8 }
 0x129   : > { %p436_p9 = pneg %p435_p7 }
 0x12b   : > { %541 = dma.done.wait (%p436_p9), %s334_s5, 128  }
 0x12c   : > { %543 = vsyncadd (%p436_p9), %s334_s5, 4294967168  ;;  %s17_s20 = sadd.s32 1, %s566_s20   ;;  %s717_s15 = smov %s550_s16 }
 0x12d   : > { %p14_p10 = scmp.ge.s32.totalorder %s17_s20, 4   ;;  %s718_s16 = smov %s554_s17 }
 0x12e   : > { %s719_s17 = smov %s646_s28  ;;  %s720_s18 = smov %s562_s19 }
 0x12f   : > { %s721_s19 = smov %s723_s23  ;;  %16 = sbr.rel (!%p14_p10) target bundleno = 4 (0x4), region = 81 }
 0x134   :  { %340 = vsyncpa [#allocation4], 1 }
 0x135   :  { %342 = vsyncpa [#allocation4 + $0x1], 1 }

</bundles_post_ra>
